<compile_context>
chip_gen: v7x
topology: tpu7x:2x2x1
jax: 0.10.0
libtpu: 0.0.40
codegen_flags: <defaults>
</compile_context>

<pallas_src>
import functools

import jax
import jax.numpy as jnp
from jax.experimental import pallas as pl
from jax.experimental.pallas import tpu as pltpu


def _wce_partial_kernel(logits_ref, targets_ref, out_ref, *, n_total, tile_n):
    """Per-tile partial sum of -log p[target], written to lane 0 of out_ref."""
    i = pl.program_id(0)

    x = logits_ref[...]                                   # (TILE_N, C) native dtype
    tn, c = x.shape

    # Validity mask for rows of a (possibly) partial last tile.
    row_ids = jax.lax.broadcasted_iota(jnp.int32, (tn, 1), 0) + i * tile_n
    valid = row_ids < n_total                              # (TILE_N, 1)

    # Row max in the native dtype (bf16 vregs hold 2x elements on v6e/v7x).
    m = jnp.max(x, axis=-1, keepdims=True)                 # (TILE_N, 1)

    # One-hot pick of the target logit straight from x (native-dtype compare /
    # select; exactly one non-zero per row, so the native-dtype sum is exact).
    # No out-of-range / ignore_index handling: targets are assumed valid, as in
    # the reference module.
    t = targets_ref[...]                                   # (TILE_N, 1) int32
    class_ids = jax.lax.broadcasted_iota(jnp.int32, (tn, c), 1)
    picked_x = jnp.sum(jnp.where(class_ids == t, x, jnp.zeros_like(x)),
                       axis=-1, keepdims=True).astype(jnp.float32)   # (TILE_N, 1)

    # Only the shifted values feeding exp are upcast to f32.
    z = (x - m).astype(jnp.float32)                        # (TILE_N, C)
    lse = jnp.log(jnp.sum(jnp.exp(z), axis=-1, keepdims=True))       # (TILE_N, 1)

    nll = m.astype(jnp.float32) + lse - picked_x           # (TILE_N, 1)
    # Keep this a select (NOT valid * nll): it must block NaN/Inf from pad rows.
    nll = jnp.where(valid, nll, 0.0)

    block_sum = jnp.sum(nll, keepdims=True)                # (1, 1)
    lane_ids = jax.lax.broadcasted_iota(jnp.int32, out_ref.shape, 1)  # (1, 128)
    out_ref[...] = jnp.where(lane_ids == 0, block_sum, 0.0).astype(out_ref.dtype)


def _vmem_capacity_bytes():
    """Physical VMEM per TensorCore; conservative fallback safe on all chips."""
    try:
        info = pltpu.get_tpu_info()
        for name in ("vmem_capacity_bytes", "vmem_size_bytes", "vmem_bytes"):
            v = getattr(info, name, None)
            if v:
                return int(v)
    except Exception:
        pass
    return 64 << 20   # v7x per-TC size; safe lower bound for v5e/v6e too.


def _per_element_working_bytes(itemsize):
    # Double-buffered native-dtype logits stream (2 x itemsize) plus the
    # in-kernel (TILE_N, C)-shaped temporaries: f32 (x - m), f32 exp(z),
    # int32 class-id iota, the native-dtype where/select result, + slack.
    return 2 * itemsize + 3 * 4 + itemsize + 4


def _choose_tile_n(n, c, itemsize, vmem_budget):
    """Largest sublane-aligned batch tile whose working set fits the budget."""
    sub = 8 if itemsize >= 4 else (16 if itemsize == 2 else 32)
    per_elem = _per_element_working_bytes(itemsize)
    rows = vmem_budget // max(1, per_elem * c)
    rows = max(sub, (rows // sub) * sub)
    if rows >= n:
        # Whole batch would fit in one tile.  Split into two tiles whenever the
        # batch allows, so the "parallel" grid axis spans both TCs on v7x.
        if n >= 2 * sub:
            rows = ((n + 1) // 2 + sub - 1) // sub * sub
        else:
            rows = n          # single full-extent block (always layout-legal)
    return rows


def weighted_cross_entropy_loss(logits, targets, weights, *, tile_n=None):
    """logits: (N, C), targets: (N,) int, weights: (N,) float -> scalar f32."""
    n, c = logits.shape
    targets2d = targets.reshape(n, 1).astype(jnp.int32)
    itemsize = logits.dtype.itemsize

    vmem_cap = _vmem_capacity_bytes()
    vmem_budget = int(vmem_cap * 5 // 8)       # ~40 MiB on v7x, ~80 MiB on v5e/v6e

    if tile_n is None:
        tile_n = _choose_tile_n(n, c, itemsize, vmem_budget)
    num_blocks = -(-n // tile_n)

    kernel = functools.partial(_wce_partial_kernel, n_total=n, tile_n=tile_n)

    # VMEM limit derived from the actual working set (double-buffered input
    # stream + f32/int32 in-kernel temporaries), capped below physical.
    working = tile_n * c * _per_element_working_bytes(itemsize) + (1 << 20)
    vmem_limit = int(min(max(32 << 20, working), vmem_cap - (4 << 20)))

    partials = pl.pallas_call(
        kernel,
        out_shape=jax.ShapeDtypeStruct((1, num_blocks * 128), jnp.float32),
        grid=(num_blocks,),
        in_specs=[
            pl.BlockSpec((tile_n, c), lambda i: (i, 0)),   # logits tile (native dtype)
            pl.BlockSpec((tile_n, 1), lambda i: (i, 0)),   # targets tile
        ],
        out_specs=pl.BlockSpec((1, 128), lambda i: (0, i)),  # lane-dense partials
        compiler_params=pltpu.CompilerParams(
            dimension_semantics=("parallel",),
            vmem_limit_bytes=vmem_limit,
        ),
    )(logits, targets2d)

    # Tiny epilogue in plain JAX: every block wrote its sum to lane 0 and zeros
    # elsewhere, so a plain sum suffices.  Mean over the TRUE batch size, then
    # multiply by mean(weights) (== mean(scalar_loss * weights)).
    ce_mean = jnp.sum(partials) / jnp.float32(n)
    w_mean = jnp.mean(weights.astype(jnp.float32))
    return ce_mean * w_mean


def _reference(logits, targets, weights):
    # Pure-JAX reference matching the torch module's semantics (f32 compute).
    logp = jax.nn.log_softmax(logits.astype(jnp.float32), axis=-1)
    nll = -jnp.take_along_axis(logp, targets[:, None].astype(jnp.int32), axis=-1)[:, 0]
    return jnp.mean(nll) * jnp.mean(weights.astype(jnp.float32))


if __name__ == "__main__":
    key = jax.random.PRNGKey(0)

    # Case 1: small shape, single block.
    k1, k2, k3 = jax.random.split(key, 3)
    N, C = 8, 32
    logits = jax.random.normal(k1, (N, C), dtype=jnp.float32)
    targets = jax.random.randint(k2, (N,), 0, C, dtype=jnp.int32)
    weights = jax.random.uniform(k3, (N,), dtype=jnp.float32)

    out = jax.block_until_ready(weighted_cross_entropy_loss(logits, targets, weights))
    ref = _reference(logits, targets, weights)
    assert jnp.allclose(out, ref, rtol=1e-5, atol=1e-5), (out, ref)

    # Case 2: multi-block grid with a partial (masked) last tile.
    k4, k5, k6 = jax.random.split(jax.random.PRNGKey(1), 3)
    N2, C2 = 40, 128
    logits2 = jax.random.normal(k4, (N2, C2), dtype=jnp.float32)
    targets2 = jax.random.randint(k5, (N2,), 0, C2, dtype=jnp.int32)
    weights2 = jax.random.uniform(k6, (N2,), dtype=jnp.float32)

    out2 = jax.block_until_ready(
        weighted_cross_entropy_loss(logits2, targets2, weights2, tile_n=16))
    ref2 = _reference(logits2, targets2, weights2)
    assert jnp.allclose(out2, ref2, rtol=1e-5, atol=1e-5), (out2, ref2)

    # Case 3: bf16 logits (native-dtype max / pick path), auto tile choice
    # (splits into 2 blocks so the parallel axis can span both TCs on v7x).
    k7, k8, k9 = jax.random.split(jax.random.PRNGKey(2), 3)
    N3, C3 = 64, 256
    logits3 = jax.random.normal(k7, (N3, C3), dtype=jnp.float32).astype(jnp.bfloat16)
    targets3 = jax.random.randint(k8, (N3,), 0, C3, dtype=jnp.int32)
    weights3 = jax.random.uniform(k9, (N3,), dtype=jnp.float32)

    out3 = jax.block_until_ready(
        weighted_cross_entropy_loss(logits3, targets3, weights3))
    ref3 = _reference(logits3, targets3, weights3)
    assert jnp.allclose(out3, ref3, rtol=5e-2, atol=5e-2), (out3, ref3)

    print("KERNEL_OK")
</pallas_src>

<mosaic_0001>
module attributes {stable_mosaic.version = 11 : i64} {
  func.func @_wce_partial_kernel(%arg0: i32, %arg1: memref<8x32xf32, #tpu.memory_space<vmem>>, %arg2: memref<8x1xi32, #tpu.memory_space<vmem>>, %arg3: memref<1x128xf32, #tpu.memory_space<vmem>>) attributes {dimension_semantics = [#tpu.dimension_semantics<parallel>], iteration_bounds = array<i64: 1>, scalar_prefetch = 0 : i64, scratch_operands = 0 : i64, tpu.core_type = #tpu.core_type<tc>, window_params = [{transform_indices = @transform_0, window_bounds = array<i64: 8, 32>}, {transform_indices = @transform_1, window_bounds = array<i64: 8, 1>}, {transform_indices = @transform_2, window_bounds = array<i64: 1, 128>}]} {
    %c0 = arith.constant 0 : index
    %c0_0 = arith.constant 0 : index
    %0 = vector.load %arg1[%c0, %c0_0] : memref<8x32xf32, #tpu.memory_space<vmem>>, vector<8x32xf32>
    %1 = tpu.iota {dimensions = array<i32: 0>} : vector<8x1xi32>
    %c8_i32 = arith.constant 8 : i32
    %2 = arith.muli %arg0, %c8_i32 : i32
    %3 = vector.broadcast %2 : i32 to vector<8x1xi32>
    %4 = arith.addi %1, %3 : vector<8x1xi32>
    %c8_i32_1 = arith.constant 8 : i32
    %5 = vector.broadcast %c8_i32_1 : i32 to vector<8x1xi32>
    %6 = arith.cmpi slt, %4, %5 : vector<8x1xi32>
    %cst = arith.constant dense<0xFF800000> : vector<8xf32>
    %7 = vector.multi_reduction <maximumf>, %0, %cst [1] : vector<8x32xf32> to vector<8xf32>
    %8 = vector.shape_cast %7 : vector<8xf32> to vector<8x1xf32>
    %c0_2 = arith.constant 0 : index
    %c0_3 = arith.constant 0 : index
    %9 = vector.load %arg2[%c0_2, %c0_3] : memref<8x1xi32, #tpu.memory_space<vmem>>, vector<8x1xi32>
    %10 = tpu.iota {dimensions = array<i32: 1>} : vector<8x32xi32>
    %11 = vector.broadcast %9 : vector<8x1xi32> to vector<8x32xi32>
    %12 = arith.cmpi eq, %10, %11 : vector<8x32xi32>
    %cst_4 = arith.constant 0.000000e+00 : f32
    %13 = vector.broadcast %cst_4 : f32 to vector<8x32xf32>
    %14 = arith.select %12, %0, %13 : vector<8x32xi1>, vector<8x32xf32>
    %cst_5 = arith.constant dense<0.000000e+00> : vector<8xf32>
    %15 = vector.multi_reduction <add>, %14, %cst_5 [1] : vector<8x32xf32> to vector<8xf32>
    %16 = vector.shape_cast %15 : vector<8xf32> to vector<8x1xf32>
    %17 = vector.broadcast %8 : vector<8x1xf32> to vector<8x32xf32>
    %18 = arith.subf %0, %17 : vector<8x32xf32>
    %19 = math.exp %18 : vector<8x32xf32>
    %cst_6 = arith.constant dense<0.000000e+00> : vector<8xf32>
    %20 = vector.multi_reduction <add>, %19, %cst_6 [1] : vector<8x32xf32> to vector<8xf32>
    %21 = vector.shape_cast %20 : vector<8xf32> to vector<8x1xf32>
    %22 = math.log %21 : vector<8x1xf32>
    %23 = arith.addf %8, %22 : vector<8x1xf32>
    %24 = arith.subf %23, %16 : vector<8x1xf32>
    %cst_7 = arith.constant 0.000000e+00 : f32
    %25 = vector.broadcast %cst_7 : f32 to vector<8x1xf32>
    %26 = arith.select %6, %24, %25 : vector<8x1xi1>, vector<8x1xf32>
    %27 = vector.shape_cast %26 : vector<8x1xf32> to vector<1x8x1xf32>
    %cst_8 = arith.constant dense<0.000000e+00> : vector<1xf32>
    %28 = vector.multi_reduction <add>, %27, %cst_8 [1, 2] : vector<1x8x1xf32> to vector<1xf32>
    %29 = vector.shape_cast %28 : vector<1xf32> to vector<1x1x1xf32>
    %30 = vector.extract %29[0, 0, 0] : f32 from vector<1x1x1xf32>
    %31 = vector.broadcast %30 : f32 to vector<1x1xf32>
    %32 = tpu.iota {dimensions = array<i32: 1>} : vector<1x128xi32>
    %c0_i32 = arith.constant 0 : i32
    %33 = vector.broadcast %c0_i32 : i32 to vector<1x128xi32>
    %34 = arith.cmpi eq, %32, %33 : vector<1x128xi32>
    %cst_9 = arith.constant 0.000000e+00 : f32
    %35 = vector.shape_cast %31 : vector<1x1xf32> to vector<1x1xf32>
    %36 = vector.broadcast %35 : vector<1x1xf32> to vector<1x128xf32>
    %37 = vector.broadcast %cst_9 : f32 to vector<1x128xf32>
    %38 = arith.select %34, %36, %37 : vector<1x128xi1>, vector<1x128xf32>
    %c0_10 = arith.constant 0 : index
    %c0_11 = arith.constant 0 : index
    %39 = vector.load %arg3[%c0_10, %c0_11] : memref<1x128xf32, #tpu.memory_space<vmem>>, vector<1x128xf32>
    tpu.vector_store %arg3[%c0_10, %c0_11], %38 {strides = array<i32>} : memref<1x128xf32, #tpu.memory_space<vmem>>, vector<1x128xf32>,
    return
  }
  func.func @transform_0(%arg0: i32) -> (i32, i32) {
    %c0_i32 = arith.constant 0 : i32
    %c0_i32_0 = arith.constant 0 : i32
    return %arg0, %c0_i32 : i32, i32
  }
  func.func @transform_1(%arg0: i32) -> (i32, i32) {
    %c0_i32 = arith.constant 0 : i32
    %c0_i32_0 = arith.constant 0 : i32
    return %arg0, %c0_i32 : i32, i32
  }
  func.func @transform_2(%arg0: i32) -> (i32, i32) {
    %c0_i32 = arith.constant 0 : i32
    %c0_i32_0 = arith.constant 0 : i32
    return %c0_i32, %arg0 : i32, i32
  }
}

</mosaic_0001>

<bundles_post_ra>
// kernel: tpu_custom_call.1
= control target key start
LH: loop header
LB: loop body
LE: loop exit
PB: predicated region body
PF: predicated region fallthrough
CT: control target
= control target key end

     0   :  { %vm19_vm0 = vcmask 261120   ;;  %s145_s0 = inlined_call_operand.vmem [shape: f32[8,32], index: 0, kind: input, shape index: {}]   ;;  %s146_s1 = inlined_call_operand.vmem [shape: s32[8,1], index: 1, kind: input, shape index: {}]   ;;  %s147_s2 = inlined_call_operand.hbm [shape: f32[1,128], index: 2, kind: output, shape index: {}]  }
   0x1   :  { %v12_v0 = vld [vmem:[%s145_s0] sm:$0xff] }
   0x2   :  { %7 = vsyncpa [#allocation3], 0  ;;  %v20_v1 = vsel %vm19_vm0, %v12_v0, -inf  ;;  %v107_v2 = vmov 0   ;;  %v23_v3 = vld [vmem:[%s146_s1] sm:$0xff]  ;;  %v24_v7 = vlaneseq  ;;  %vm45_vm2 = vcmask 7168  }
   0x3   :  { %78 = vset.pattern.permute.xlu0 %v107_v2  ;;  %s108_s0 = smov [#allocation2]  }
   0x4   :  { %21 = vmax.xlane.f32.xlu0 %v20_v1  ;;  %v25_v8 = vand.u32 127, %v24_v7  ;;  %s66_s1 = sshll.u32 %s108_s0, 4  ;;  %s67_s1 = int_to_ptr.vmem [resolvable:$true] %s66_s1 }
   0x5   :  { %s83_s14 = scalar_lea.vmem %s67_s1, 16  ;;  %s87_s15 = scalar_lea.vmem %s67_s1, 32 }
   0x6   :  { %vm56_vm3 = vcmp.eq.s32.totalorder %v25_v8, 0  ;;  %p84_p0 = scmp.ne.s32.totalorder %s67_s1, %s83_s14  ;;  %p88_p1 = scmp.lt.s32.totalorder %s67_s1, %s67_s1 }
   0x7   :  { %p89_p2 = scmp.lt.s32.totalorder %s87_s15, %s83_s14 }
   0x9   :  { %p90_p3 = por %p89_p2, %p88_p1 }
   0xb   :  { %p91_p4 = pnand %p90_p3, %p84_p0 }
  0x1a   :  { %27 = vperm.xlu0 %78, %v23_v3  }
  0x91   :  { %v22_v4 = vpop.xlane.xlu0 %21 }
  0x92   :  { %v34_v5 = vsub.f32 %v12_v0, %v22_v4 }
  0x94   :  { %v35_v6 = vmul.f32 1.442695, %v34_v5 }
  0x96   :  { %79 = vpow2.f32 %v35_v6 }
  0x99   :  { %v28_v9 = vpop.permute.xlu0 %27 }
  0x9a   :  { %vm29_vm1 = vcmp.eq.s32.totalorder %v25_v8, %v28_v9 }
  0x9b   :  { %v30_v11 = vsel %vm29_vm1, %v12_v0, 0.0 }
  0x9c   :  { %v31_v13 = vsel %vm19_vm0, %v30_v11, 0.0 }
  0xa0   :  { %v80_v10 = vpop.eup %79 }
  0xa1   :  { %v37_v12 = vsel %vm19_vm0, %v80_v10, 0.0 }
  0xa2   :  { %38 = vadd.xlane.f32.xlu1 %v37_v12 }
  0xa6   :  { %32 = vadd.xlane.f32.xlu1 %v31_v13 }
 0x12f   :  { %v39_v14 = vpop.xlane.xlu1 %38 }
 0x130   :  { %81 = vlog2.f32 %v39_v14 }
 0x133   :  { %v33_v17 = vpop.xlane.xlu1 %32 }
 0x13a   :  { %v82_v15 = vpop.eup %81 }
 0x13b   :  { %v41_v16 = vmul.f32 0.6931472, %v82_v15 }
 0x13d   :  { %v42_v18 = vadd.f32 %v41_v16, %v22_v4 }
 0x13f   :  { %v43_v19 = vsub.f32 %v42_v18, %v33_v17 }
 0x141   :  { %v46_v20 = vsel %vm45_vm2, %v43_v19, 0.0 }
 0x142   :  { %47 = vadd.xlane.f32.xlu1 %v46_v20 }
 0x1cf   :  { %v48_v21 = vpop.xlane.xlu1 %47 }
 0x1d0   :  { %v49_v22 = vrot.slane %v48_v21, 4 }
 0x1d2   :  { %v50_v23 = vadd.f32 %v49_v22, %v48_v21 }
 0x1d4   :  { %v51_v24 = vrot.slane %v50_v23, 2 }
 0x1d6   :  { %v52_v25 = vadd.f32 %v51_v24, %v50_v23 }
 0x1d8   :  { %v53_v26 = vrot.slane %v52_v25, 1 }
 0x1da   :  { %v54_v27 = vadd.f32 %v53_v26, %v52_v25 }
 0x1dc   :  { %74 = vpush %v54_v27 }
 0x20d   :  { %s75_s13 = spop %74 }
 0x20e   :  { %v57_v28 = vstv %s75_s13 }
 0x20f   :  { %v58_v29 = vsel %vm56_vm3, %v57_v28, 0.0 }
 0x210   :  { %59 = vst [vmem:[#allocation2] sm:$0x1] %v58_v29 }
 0x211   :  { %94 = shalt.err (!%p91_p4)
}
 0x212   :  { %s95_s18 = scalar_lea.hbm %s147_s2, 16 }
 0x213   :  { %p96_p5 = scmp.ne.s32.totalorder %s147_s2, %s95_s18  ;;  %p99_p6 = scmp.lt.u32.totalorder %s95_s18, %s147_s2 }
 0x215   :  { %p101_p7 = pnand %p99_p6, %p96_p5 }
 0x217   :  { %104 = shalt.err (!%p101_p7)
}
 0x218   :  { %69 = dma.vmem_to_hbm [thread:$0]  %s67_s1, 16, %s147_s2, [#allocation3]  }
 0x219   :  { %105 = dma.done.wait [#allocation3], 16  }
 0x21a   :  { %106 = vsyncadd [#allocation3], 4294967280 }
 0x21b   :  { %73 = vsyncpa [#allocation3], 1 }

</bundles_post_ra>
